<compile_context>
chip_gen: v5e
topology: v5e:2x2
jax: 0.10.0
libtpu: 0.0.40
codegen_flags: <defaults>
</compile_context>

<pallas_src>
import jax
import jax.numpy as jnp
from jax import lax
from jax.experimental import pallas as pl
from jax.experimental.pallas import tpu as pltpu


def _round_up(n, m):
    return ((n + m - 1) // m) * m


def _sublane_multiple(dtype) -> int:
    # Rows per packed sublane tile: 8 for f32, 16 for bf16, 32 for int8/fp8.
    return max(8, 32 // jnp.dtype(dtype).itemsize)


# ------------------------------ SiLU kernel ---------------------------------
def _silu_kernel(x_ref, o_ref):
    # Gate math in f32 (sigmoid goes to the EUP; cast cost is hidden under the
    # HBM-bound roofline), store back in the native dtype.
    x = x_ref[...].astype(jnp.float32)
    o_ref[...] = (x * jax.nn.sigmoid(x)).astype(o_ref.dtype)


def _silu_2d(x2d, *, target_tile_bytes=2 * 1024 * 1024):
    """Row-tiled elementwise SiLU over a 2-D view (M, d)."""
    M, d = x2d.shape
    itemsize = jnp.dtype(x2d.dtype).itemsize
    sub = _sublane_multiple(x2d.dtype)

    # Largest row tile that keeps a double-buffered in+out pair at a few MiB,
    # is a multiple of the sublane packing, and does not exceed padded M.
    tm = max(1, target_tile_bytes // max(1, d * itemsize))
    tm = max(sub, (tm // sub) * sub)
    tm = min(tm, _round_up(M, sub))

    Mp = _round_up(M, tm)
    if Mp != M:
        x2d = jnp.pad(x2d, ((0, Mp - M), (0, 0)))  # SiLU(0) == 0: padding is inert

    out = pl.pallas_call(
        _silu_kernel,
        out_shape=jax.ShapeDtypeStruct((Mp, d), x2d.dtype),
        grid=(Mp // tm,),
        in_specs=[pl.BlockSpec((tm, d), lambda i: (i, 0))],
        out_specs=pl.BlockSpec((tm, d), lambda i: (i, 0)),
        compiler_params=pltpu.CompilerParams(
            dimension_semantics=("parallel",)),
    )(x2d)
    return out[:M] if Mp != M else out


def silu_forward(x):
    """Elementwise SiLU on any shape (..., d_model) — the module's forward."""
    orig_shape = x.shape
    d = orig_shape[-1] if x.ndim >= 1 else 1
    if x.ndim >= 2 and d % 128 == 0:
        # Last dim already lane-aligned: keep the natural (tokens, d) layout.
        return _silu_2d(x.reshape(-1, d)).reshape(orig_shape)
    # Otherwise flatten everything and present a lane-dense (multiple-of-128)
    # 2-D view so stores are unmasked; pad the tail with zeros and slice back.
    lane = 512
    flat = x.reshape(-1)
    n = flat.size
    pad = (-n) % lane
    if pad:
        flat = jnp.pad(flat, (0, pad))
    out = _silu_2d(flat.reshape(-1, lane))
    return out.reshape(-1)[:n].reshape(orig_shape)


# ---------------------- Fused SWiGLU (uses SiLU in-kernel) ------------------
# out = (silu(x @ w1.T) * (x @ w3.T)) @ w2.T with weights kept in PyTorch
# layout (w1, w3: (d_ff, d_model); w2: (d_model, d_ff)) — no wrapper-side
# transposes; dot_general contracts the matching dims directly on the MXU.
_DN = (((1,), (1,)), ((), ()))  # contract lhs last dim with rhs last dim


def _swiglu_kernel(x_ref, w1_ref, w3_ref, w2_ref, o_ref, acc_ref):
    k = pl.program_id(1)

    @pl.when(k == 0)
    def _init():
        acc_ref[...] = jnp.zeros_like(acc_ref)

    x = x_ref[...]  # native dtype feeds the MXU; accumulate in f32
    h1 = lax.dot_general(x, w1_ref[...], _DN, preferred_element_type=jnp.float32)
    h3 = lax.dot_general(x, w3_ref[...], _DN, preferred_element_type=jnp.float32)
    h = (h1 * jax.nn.sigmoid(h1)) * h3                  # SiLU gate math in f32
    acc_ref[...] += lax.dot_general(
        h.astype(w2_ref.dtype), w2_ref[...], _DN,
        preferred_element_type=jnp.float32)

    @pl.when(k == pl.num_programs(1) - 1)
    def _store():
        o_ref[...] = acc_ref[...].astype(o_ref.dtype)


def _pick_ff_tile(d_ff, target):
    if d_ff <= target:
        return d_ff
    tk = (target // 128) * 128
    while tk >= 128:
        if d_ff % tk == 0:
            return tk
        tk -= 128
    return d_ff


def swiglu_forward(x, w1, w2, w3, *, tm=256, tk=512):
    """x: (..., d_model); w1, w3: (d_ff, d_model); w2: (d_model, d_ff)."""
    orig_shape = x.shape
    d_model = x.shape[-1]
    d_ff = w1.shape[0]

    x2d = x.reshape(-1, d_model)
    M = x2d.shape[0]
    sub = _sublane_multiple(x.dtype)
    tm = max(sub, (min(tm, _round_up(M, sub)) // sub) * sub)
    Mp = _round_up(M, tm)
    if Mp != M:
        x2d = jnp.pad(x2d, ((0, Mp - M), (0, 0)))  # zero rows contribute zero
    tk = _pick_ff_tile(d_ff, tk)

    out2d = pl.pallas_call(
        _swiglu_kernel,
        out_shape=jax.ShapeDtypeStruct((Mp, d_model), x.dtype),
        grid_spec=pltpu.PrefetchScalarGridSpec(
            num_scalar_prefetch=0,
            grid=(Mp // tm, d_ff // tk),  # token axis first, reduction axis last
            in_specs=[
                pl.BlockSpec((tm, d_model), lambda i, k: (i, 0)),   # x tile
                pl.BlockSpec((tk, d_model), lambda i, k: (k, 0)),   # w1 slab
                pl.BlockSpec((tk, d_model), lambda i, k: (k, 0)),   # w3 slab
                pl.BlockSpec((d_model, tk), lambda i, k: (0, k)),   # w2 slab
            ],
            out_specs=pl.BlockSpec((tm, d_model), lambda i, k: (i, 0)),
            scratch_shapes=[pltpu.VMEM((tm, d_model), jnp.float32)],
        ),
        compiler_params=pltpu.CompilerParams(
            dimension_semantics=("parallel", "arbitrary"),
            vmem_limit_bytes=48 * 1024 * 1024),
    )(x2d, w1, w3, w2)

    out2d = out2d[:M] if Mp != M else out2d
    return out2d.reshape(orig_shape)


if __name__ == "__main__":
    key = jax.random.PRNGKey(0)
    k1, k2, k3, k4, k5, k6 = jax.random.split(key, 6)

    # --- SiLU (the module's forward), f32, shape (batch=2, seq=8, d_model=32)
    x = jax.random.normal(k1, (2, 8, 32), dtype=jnp.float32)
    out = jax.block_until_ready(silu_forward(x))
    ref = x * jax.nn.sigmoid(x)
    assert out.shape == x.shape
    assert jnp.allclose(out, ref, atol=1e-5, rtol=1e-5), "SiLU f32 mismatch"

    # --- SiLU, bf16 with a lane-aligned last dim (natural-layout path)
    xb = jax.random.normal(k2, (4, 16, 256), dtype=jnp.float32).astype(jnp.bfloat16)
    outb = jax.block_until_ready(silu_forward(xb))
    xb32 = xb.astype(jnp.float32)
    refb = (xb32 * jax.nn.sigmoid(xb32)).astype(jnp.bfloat16)
    assert outb.shape == xb.shape
    assert jnp.allclose(outb.astype(jnp.float32), refb.astype(jnp.float32),
                        atol=1e-2, rtol=1e-2), "SiLU bf16 mismatch"

    # --- Fused SWiGLU demo (small shapes; exercises the d_ff reduction axis)
    d_model, d_ff = 64, 256
    xs = jax.random.normal(k3, (2, 8, d_model), dtype=jnp.float32)
    std = (2.0 / (d_model + d_ff)) ** 0.5
    w1 = std * jax.random.truncated_normal(k4, -3.0, 3.0, (d_ff, d_model), jnp.float32)
    w3 = std * jax.random.truncated_normal(k5, -3.0, 3.0, (d_ff, d_model), jnp.float32)
    w2 = std * jax.random.truncated_normal(k6, -3.0, 3.0, (d_model, d_ff), jnp.float32)
    outs = jax.block_until_ready(swiglu_forward(xs, w1, w2, w3, tm=256, tk=128))
    h1 = jnp.einsum("...i,fi->...f", xs, w1)
    h3 = jnp.einsum("...i,fi->...f", xs, w3)
    refs = jnp.einsum("...f,of->...o", h1 * jax.nn.sigmoid(h1) * h3, w2)
    assert outs.shape == xs.shape
    assert jnp.allclose(outs, refs, atol=1e-4, rtol=1e-4), "SWiGLU mismatch"

    print("KERNEL_OK")
</pallas_src>

<mosaic_0001>
module attributes {stable_mosaic.version = 11 : i64} {
  func.func @_silu_kernel(%arg0: i32, %arg1: memref<8x512xf32, #tpu.memory_space<vmem>>, %arg2: memref<8x512xf32, #tpu.memory_space<vmem>>) attributes {dimension_semantics = [#tpu.dimension_semantics<parallel>], iteration_bounds = array<i64: 1>, scalar_prefetch = 0 : i64, scratch_operands = 0 : i64, tpu.core_type = #tpu.core_type<tc>, window_params = [{transform_indices = @transform_0, window_bounds = array<i64: 8, 512>}, {transform_indices = @transform_1, window_bounds = array<i64: 8, 512>}]} {
    %c0 = arith.constant 0 : index
    %c0_0 = arith.constant 0 : index
    %0 = vector.load %arg1[%c0, %c0_0] : memref<8x512xf32, #tpu.memory_space<vmem>>, vector<8x512xf32>
    %1 = arith.negf %0 : vector<8x512xf32>
    %2 = math.exp %1 : vector<8x512xf32>
    %cst = arith.constant 1.000000e+00 : f32
    %3 = vector.broadcast %cst : f32 to vector<8x512xf32>
    %4 = arith.addf %3, %2 : vector<8x512xf32>
    %5 = arith.divf %3, %4 : vector<8x512xf32>
    %6 = arith.mulf %0, %5 : vector<8x512xf32>
    %c0_1 = arith.constant 0 : index
    %c0_2 = arith.constant 0 : index
    %7 = vector.load %arg2[%c0_1, %c0_2] : memref<8x512xf32, #tpu.memory_space<vmem>>, vector<8x512xf32>
    tpu.vector_store %arg2[%c0_1, %c0_2], %6 {strides = array<i32>} : memref<8x512xf32, #tpu.memory_space<vmem>>, vector<8x512xf32>,
    return
  }
  func.func @transform_0(%arg0: i32) -> (i32, i32) {
    %c0_i32 = arith.constant 0 : i32
    %c0_i32_0 = arith.constant 0 : i32
    return %arg0, %c0_i32 : i32, i32
  }
  func.func @transform_1(%arg0: i32) -> (i32, i32) {
    %c0_i32 = arith.constant 0 : i32
    %c0_i32_0 = arith.constant 0 : i32
    return %arg0, %c0_i32 : i32, i32
  }
}

</mosaic_0001>

<bundles_post_ra>
// kernel: tpu_custom_call.1
= control target key start
LH: loop header
LB: loop body
LE: loop exit
PB: predicated region body
PF: predicated region fallthrough
CT: control target
= control target key end

     0   :  { %6 = vsyncpa [#allocation3], 0  ;;  %s276_s0 = inlined_call_operand.hbm [shape: f32[8,512], index: 0, kind: input, shape index: {}]   ;;  %s277_s1 = inlined_call_operand.hbm [shape: f32[8,512], index: 1, kind: output, shape index: {}]  }
   0x1   :  { %7 = vsyncpa [#allocation4], 0  ;;  %s13_s8 = sshll.u32 %s276_s0, 4  ;;  %s202_s9 = smov [#allocation2]   ;;  %s14_s8 = int_to_ptr.hbm [resolvable:$true] %s13_s8 }
   0x2   :  { %s15_s10 = sshll.u32 %s202_s9, 4  ;;  %s16_s10 = int_to_ptr.vmem [resolvable:$true] %s15_s10 }
   0x3   :  { %18 = dma.hbm_to_vmem [thread:$0]  %s14_s8, 512, %s16_s10, [#allocation3]  }
   0x4   :  { %198 = dma.done.wait [#allocation3], 512  }
   0x5   :  { %199 = vsyncadd [#allocation3], 4294966784  ;;  %v217_v0 = vld [vmem:[#allocation2] sm:$0xff]  ;;  %v219_v1 = vld [vmem:[#allocation2 + $0x8] sm:$0xff]  ;;  %s203_s0 = smov [#allocation5]   ;;  %s118_s14 = sshll.u32 %s277_s1, 4  ;;  %s119_s14 = int_to_ptr.hbm [resolvable:$true] %s118_s14 }
   0x6   :  { %v221_v2 = vld [vmem:[#allocation2 + $0x10] sm:$0xff]  ;;  %v128_v3 = vmul.f32 -1.442695, %v217_v0  ;;  %v129_v4 = vmul.f32 -1.442695, %v219_v1  ;;  %v226_v6 = vld [vmem:[#allocation2 + $0x18] sm:$0xff] }
   0x7   :  { %v130_v5 = vmul.f32 -1.442695, %v221_v2  ;;  %v131_v7 = vmul.f32 -1.442695, %v226_v6  ;;  %s116_s11 = sshll.u32 %s203_s0, 4  ;;  %s117_s11 = int_to_ptr.vmem [resolvable:$true] %s116_s11 }
   0x8   :  { %134 = vpow2.f32 %v128_v3 }
   0x9   :  { %136 = vpow2.f32 %v129_v4 }
   0xa   :  { %138 = vpow2.f32 %v130_v5 }
   0xb   :  { %140 = vpow2.f32 %v131_v7 }
   0xe   :  { %v135_v8 = vpop.eup %134 }
   0xf   :  { %v137_v9 = vpop.eup %136  ;;  %v39_v10 = vadd.f32 1.0, %v135_v8 }
  0x10   :  { %v139_v11 = vpop.eup %138  ;;  %v40_v12 = vadd.f32 1.0, %v137_v9 }
  0x11   :  { %v141_v13 = vpop.eup %140  ;;  %142 = vrcp.f32 %v39_v10  ;;  %v41_v14 = vadd.f32 1.0, %v139_v11  ;;  %v52_v16 = vand.u32 2147483647, %v39_v10  ;;  %v54_v17 = vand.u32 2147483648, %v39_v10 }
  0x12   :  { %144 = vrcp.f32 %v40_v12  ;;  %v42_v15 = vadd.f32 1.0, %v141_v13  ;;  %v67_v19 = vand.u32 2147483647, %v40_v12  ;;  %v69_v20 = vand.u32 2147483648, %v40_v12 }
  0x13   :  { %146 = vrcp.f32 %v41_v14  ;;  %vm48_vm0 = vweird.f32 %v39_v10  ;;  %vm63_vm1 = vweird.f32 %v40_v12  ;;  %vm229_vm3 = vcmp.eq.f32.partialorder %v52_v16, 8.507059e+37 }
  0x14   :  { %148 = vrcp.f32 %v42_v15  ;;  %v55_v26 = vor.u32 1.1754944e-38, %v54_v17  ;;  %vm233_vm5 = vcmp.eq.f32.partialorder %v67_v19, 8.507059e+37  ;;  %v70_v30 = vor.u32 1.1754944e-38, %v69_v20 }
  0x15   :  { %vm78_vm6 = vweird.f32 %v41_v14  ;;  %v82_v34 = vand.u32 2147483647, %v41_v14  ;;  %v84_v37 = vand.u32 2147483648, %v41_v14  ;;  %vm93_vm8 = vweird.f32 %v42_v15 }
  0x16   :  { %v99_v42 = vand.u32 2147483648, %v42_v15  ;;  %v97_v45 = vand.u32 2147483647, %v42_v15 }
  0x17   :  { %v143_v18 = vpop.eup %142  ;;  %vm249_vm12 = vcmp.eq.f32.partialorder %v82_v34, 8.507059e+37  ;;  %v85_v52 = vor.u32 1.1754944e-38, %v84_v37 }
  0x18   :  { %v145_v21 = vpop.eup %144  ;;  %v44_v22 = vmul.f32 %v143_v18, %v39_v10  ;;  %vm49_vm2 = vweird.f32 %v143_v18  ;;  %v100_v57 = vor.u32 1.1754944e-38, %v99_v42  ;;  %vm98_vm15 = vcmp.eq.f32.partialorder %v97_v45, 8.507059e+37 }
  0x19   :  { %v59_v23 = vmul.f32 %v145_v21, %v40_v12  ;;  %v147_v27 = vpop.eup %146  ;;  %vm64_vm4 = vweird.f32 %v145_v21  ;;  %vm238_vm7 = vmor %vm48_vm0, %vm49_vm2 }
  0x1a   :  { %v45_v24 = vsub.f32 1.0, %v44_v22  ;;  %v149_v31 = vpop.eup %148  ;;  %v74_v33 = vmul.f32 %v147_v27, %v41_v14  ;;  %vm243_vm9 = vmor %vm63_vm1, %vm64_vm4  ;;  %vm79_vm10 = vweird.f32 %v147_v27 }
  0x1b   :  { %v60_v28 = vsub.f32 1.0, %v59_v23  ;;  %v89_v38 = vmul.f32 %v149_v31, %v42_v15  ;;  %vm94_vm11 = vweird.f32 %v149_v31  ;;  %vm258_vm13 = vmor %vm78_vm6, %vm79_vm10 }
  0x1c   :  { %v46_v32 = vmul.f32 %v143_v18, %v45_v24  ;;  %v75_v41 = vsub.f32 1.0, %v74_v33  ;;  %vm95_vm14 = vmor %vm93_vm8, %vm94_vm11 }
  0x1d   :  { %v61_v36 = vmul.f32 %v145_v21, %v60_v28  ;;  %v90_v44 = vsub.f32 1.0, %v89_v38 }
  0x1e   :  { %v47_v39 = vadd.f32 %v143_v18, %v46_v32  ;;  %v76_v47 = vmul.f32 %v147_v27, %v75_v41 }
  0x1f   :  { %v62_v43 = vadd.f32 %v145_v21, %v61_v36  ;;  %v91_v53 = vmul.f32 %v149_v31, %v90_v44 }
  0x20   :  { %v51_v46 = vsel %vm238_vm7, %v143_v18, %v47_v39  ;;  %v77_v56 = vadd.f32 %v147_v27, %v76_v47 }
  0x21   :  { %v56_v49 = vsel %vm229_vm3, %v55_v26, %v51_v46  ;;  %v66_v50 = vsel %vm243_vm9, %v145_v21, %v62_v43  ;;  %v92_v59 = vadd.f32 %v149_v31, %v91_v53 }
  0x22   :  { %v103_v54 = vmul.f32 %v56_v49, %v217_v0  ;;  %v71_v55 = vsel %vm233_vm5, %v70_v30, %v66_v50  ;;  %v81_v60 = vsel %vm258_vm13, %v147_v27, %v77_v56 }
  0x23   :  { %v104_v58 = vmul.f32 %v71_v55, %v219_v1  ;;  %v86_v61 = vsel %vm249_vm12, %v85_v52, %v81_v60  ;;  %v96_v62 = vsel %vm95_vm14, %v149_v31, %v92_v59 }
  0x24   :  { %107 = vst [vmem:[#allocation5] sm:$0xff] %v103_v54  ;;  %v105_v63 = vmul.f32 %v86_v61, %v221_v2  ;;  %v101_v0 = vsel %vm98_vm15, %v100_v57, %v96_v62 }
  0x25   :  { %108 = vst [vmem:[#allocation5 + $0x8] sm:$0xff] %v104_v58  ;;  %v106_v1 = vmul.f32 %v101_v0, %v226_v6 }
  0x26   :  { %109 = vst [vmem:[#allocation5 + $0x10] sm:$0xff] %v105_v63 }
  0x27   :  { %110 = vst [vmem:[#allocation5 + $0x18] sm:$0xff] %v106_v1 }
  0x28   :  { %121 = dma.vmem_to_hbm [thread:$0]  %s117_s11, 512, %s119_s14, [#allocation4]  }
  0x29   :  { %200 = dma.done.wait [#allocation4], 512  }
  0x2a   :  { %201 = vsyncadd [#allocation4], 4294966784 }
  0x2b   :  { %126 = vsyncpa [#allocation3], 1 }
  0x2c   :  { %127 = vsyncpa [#allocation4], 1 }

</bundles_post_ra>
